<compile_context>
chip_gen: v7x
topology: tpu7x:2x2x1
jax: 0.10.0
libtpu: 0.0.40
codegen_flags: <defaults>
</compile_context>

<pallas_src>
import numpy as np
import jax
import jax.numpy as jnp
from jax.experimental import pallas as pl
from jax.experimental.pallas import tpu as pltpu

ALPHA = 0.2        # LeakyReLU negative slope (module's `alpha`)
DROPOUT = 0.6      # module's `dropout` (identity in eval mode)
NEG_BIG = -9.0e15  # PyTorch's zero_vec fill value
LANE = 128


def _round_up(v, m):
    return (v + m - 1) // m * m


def _pick_tile(n, requested):
    """Largest power-of-two multiple of 128 <= requested and <= round_up(n, 128)."""
    t = LANE
    cap = _round_up(max(n, 1), LANE)
    while t * 2 <= requested and t * 2 <= cap:
        t *= 2
    return t


# ---------------------------------------------------------------------------
# Kernel 1: projection.  h = x @ W  and  f = x @ Wa  (Wa = W @ [a1|a2], folded
# host-side in fp32, padded to 128 lanes so the f store is unmasked).
# ---------------------------------------------------------------------------
def proj_kernel(x_ref, w_ref, wa_ref, h_ref, f_ref):
    x = x_ref[...]
    h_ref[...] = jnp.dot(x, w_ref[...],
                         preferred_element_type=jnp.float32).astype(h_ref.dtype)
    f_ref[...] = jnp.dot(x, wa_ref[...], preferred_element_type=jnp.float32)


# ---------------------------------------------------------------------------
# Kernel 2: tiled masked attention with online softmax + ELU, block-sparse skip.
#   grid = (Npad // TQ ["parallel"], Npad // TK ["arbitrary"])
#   cnt_ref: SMEM scalar-prefetch array of per-(i, k) tile edge counts.
# ---------------------------------------------------------------------------
def attn_kernel(cnt_ref, f1_ref, f2_ref, adj_ref, h_ref, o_ref,
                m_ref, l_ref, acc_ref):
    i = pl.program_id(0)
    k = pl.program_id(1)
    nk = pl.num_programs(1)

    @pl.when(k == 0)
    def _():
        m_ref[...] = jnp.full(m_ref.shape, -jnp.inf, m_ref.dtype)
        l_ref[...] = jnp.zeros(l_ref.shape, l_ref.dtype)
        acc_ref[...] = jnp.zeros(acc_ref.shape, acc_ref.dtype)

    # Skip the whole tile if no edge lands in this (query-tile, key-tile) block:
    # its contribution would be exp(-9e15 - m) == 0 anyway (given any real edge).
    @pl.when(cnt_ref[i * nk + k] > 0)
    def _():
        # e[i, j] = LeakyReLU(f1[i] + f2[j]), masked by adjacency (fp32 math).
        e = f1_ref[...] + f2_ref[...]                    # (TQ,1)+(1,TK) -> (TQ,TK)
        e = jnp.where(e > 0, e, ALPHA * e)               # LeakyReLU
        e = jnp.where(adj_ref[...] > 0, e, NEG_BIG)      # non-edges -> -9e15

        # Online softmax update (running max / normalizer / accumulator, fp32).
        m_prev = m_ref[...]
        m_new = jnp.maximum(m_prev, jnp.max(e, axis=1, keepdims=True))
        rescale = jnp.exp(m_prev - m_new)
        p = jnp.exp(e - m_new)                           # fp32 probabilities
        l_ref[...] = rescale * l_ref[...] + jnp.sum(p, axis=1, keepdims=True)
        acc_ref[...] = rescale * acc_ref[...] + jnp.dot(
            p.astype(h_ref.dtype), h_ref[...], preferred_element_type=jnp.float32)
        m_ref[...] = m_new

    @pl.when(k == nk - 1)
    def _():
        l = l_ref[...]
        inv = jnp.where(l > 0.0, 1.0 / l, 0.0)           # exact; once per q tile
        hp = acc_ref[...] * inv
        o_ref[...] = jnp.where(hp > 0, hp, jnp.exp(jnp.minimum(hp, 0.0)) - 1.0)


def gat_forward(x, W, a, edges, *, tq=512, tk=512, matmul_dtype=jnp.bfloat16):
    """GraphAttentionLayer forward (eval mode).

    x: (N, F_in) fp32, W: (F_in, F_out) fp32, a: (2*F_out, 1) fp32,
    edges: (2, E) int32.  Returns (N, F_out) fp32.
    """
    N, Fin = x.shape
    Fout = W.shape[1]
    Fpad = max(LANE, _round_up(Fout, LANE))   # lane-dense feature width

    # ---- tile selection: big tiles; keep >= 2 query tiles for v7x megacore ----
    tk = _pick_tile(N, tk)
    tq = _pick_tile(N, tq)
    Npad = _round_up(N, max(tq, tk))
    while tq > LANE and Npad // tq < 2:
        tq //= 2
    assert Npad % tq == 0 and Npad % tk == 0
    nq, nk = Npad // tq, Npad // tk

    # Dense int8 adjacency at padded size (padded rows/cols stay non-edges);
    # `.set(1)` matches torch's `adj > 0` on the summed sparse tensor.
    adj = jnp.zeros((Npad, Npad), jnp.int8).at[edges[0], edges[1]].set(1)

    # Per-(query-tile, key-tile) edge counts for block-sparsity (scalar prefetch).
    blk_cnt = (jnp.zeros((nq, nk), jnp.int32)
               .at[edges[0] // tq, edges[1] // tk].add(1))
    counts = blk_cnt.reshape(-1)

    # ---- fp32 host-side parameter folding: Wa = W @ [a1 | a2], lane-padded ----
    HI = jax.lax.Precision.HIGHEST
    wa1 = jnp.dot(W, a[:Fout, :], precision=HI)          # (Fin, 1)
    wa2 = jnp.dot(W, a[Fout:, :], precision=HI)          # (Fin, 1)
    Wa_pad = (jnp.zeros((Fin, LANE), jnp.float32)
              .at[:, 0:1].set(wa1).at[:, 1:2].set(wa2))
    W_pad = jnp.zeros((Fin, Fpad), jnp.float32).at[:, :Fout].set(W)

    x_pad = jnp.zeros((Npad, Fin), jnp.float32).at[:N, :].set(x)
    x_c = x_pad.astype(matmul_dtype)
    W_c = W_pad.astype(matmul_dtype)
    Wa_c = Wa_pad.astype(matmul_dtype)

    cost1 = pl.CostEstimate(
        flops=int(2 * Npad * Fin * (Fpad + LANE)),
        transcendentals=0,
        bytes_accessed=int(Npad * Fin * 2 + Fin * (Fpad + LANE) * 2
                           + Npad * Fpad * 2 + Npad * LANE * 4))

    # ---- kernel 1: h = x @ W and f = x @ Wa ----------------------------------
    h, f = pl.pallas_call(
        proj_kernel,
        out_shape=(jax.ShapeDtypeStruct((Npad, Fpad), matmul_dtype),
                   jax.ShapeDtypeStruct((Npad, LANE), jnp.float32)),
        grid_spec=pltpu.PrefetchScalarGridSpec(
            num_scalar_prefetch=0,
            grid=(Npad // tq,),
            in_specs=[
                pl.BlockSpec((tq, Fin), lambda i: (i, 0)),
                pl.BlockSpec((Fin, Fpad), lambda i: (0, 0)),
                pl.BlockSpec((Fin, LANE), lambda i: (0, 0)),
            ],
            out_specs=(
                pl.BlockSpec((tq, Fpad), lambda i: (i, 0)),
                pl.BlockSpec((tq, LANE), lambda i: (i, 0)),
            )),
        compiler_params=pltpu.CompilerParams(
            dimension_semantics=("parallel",),
            vmem_limit_bytes=32 * 1024 * 1024),
        cost_estimate=cost1,
    )(x_c, W_c, Wa_c)

    f1 = f[:, 0:1]                      # (Npad, 1)  query-side logit term
    f2row = f[:, 1].reshape(1, Npad)    # (1, Npad)  key-side logit term (row)

    cost2 = pl.CostEstimate(
        flops=int(2 * Npad * Npad * Fpad + 8 * Npad * Npad),
        transcendentals=int(Npad * Npad + Npad * nk),
        bytes_accessed=int(Npad * Npad            # int8 adjacency
                           + nq * Npad * Fpad * 2  # h re-streamed per query tile
                           + Npad * Fpad * 4       # output
                           + Npad * 8))            # f1 / f2

    # ---- kernel 2: tiled masked softmax attention + ELU ----------------------
    # (If a profile ever shows exposed DMA behind compute, add
    #  pipeline_mode=pl.Buffered(3) on the adj / h specs.)
    out_pad = pl.pallas_call(
        attn_kernel,
        out_shape=jax.ShapeDtypeStruct((Npad, Fpad), jnp.float32),
        grid_spec=pltpu.PrefetchScalarGridSpec(
            num_scalar_prefetch=1,
            grid=(nq, nk),
            in_specs=[
                pl.BlockSpec((tq, 1), lambda i, k, c: (i, 0)),     # f1 (query)
                pl.BlockSpec((1, tk), lambda i, k, c: (0, k)),     # f2 (key, row)
                pl.BlockSpec((tq, tk), lambda i, k, c: (i, k)),    # adjacency
                pl.BlockSpec((tk, Fpad), lambda i, k, c: (k, 0)),  # h key/value
            ],
            out_specs=pl.BlockSpec((tq, Fpad), lambda i, k, c: (i, 0)),
            scratch_shapes=[
                pltpu.VMEM((tq, 1), jnp.float32),      # running max
                pltpu.VMEM((tq, 1), jnp.float32),      # running normalizer
                pltpu.VMEM((tq, Fpad), jnp.float32),   # output accumulator
            ]),
        compiler_params=pltpu.CompilerParams(
            dimension_semantics=("parallel", "arbitrary"),
            vmem_limit_bytes=32 * 1024 * 1024),
        cost_estimate=cost2,
    )(counts, f1, f2row, adj, h)

    return out_pad[:N, :Fout]


# ---------------------------------------------------------------------------
# Host-side helpers: init + pure-JAX fp32 reference of the PyTorch forward.
# ---------------------------------------------------------------------------
def xavier_uniform(key, shape, gain):
    fan_in, fan_out = shape[0], shape[1]
    bound = gain * np.sqrt(6.0 / (fan_in + fan_out))
    return jax.random.uniform(key, shape, jnp.float32, -bound, bound)


def reference_forward(x, W, a, edges):
    HI = jax.lax.Precision.HIGHEST
    N = x.shape[0]
    Fout = W.shape[1]
    adj = jnp.zeros((N, N), jnp.float32).at[edges[0], edges[1]].add(1.0)
    h = jnp.dot(x, W, precision=HI)
    e = (jnp.dot(h, a[:Fout, :], precision=HI)
         + jnp.dot(h, a[Fout:, :], precision=HI).T)
    e = jnp.where(e > 0, e, ALPHA * e)
    att = jnp.where(adj > 0, e, NEG_BIG)
    att = jax.nn.softmax(att, axis=1)
    hp = jnp.dot(att, h, precision=HI)
    return jnp.where(hp > 0, hp, jnp.exp(jnp.minimum(hp, 0.0)) - 1.0)


if __name__ == "__main__":
    # N deliberately NOT a tile multiple to exercise the tail-padding path.
    N, F_IN, F_OUT = 300, 16, 16
    key = jax.random.PRNGKey(0)
    k_x, k_w, k_a = jax.random.split(key, 3)

    x = jax.random.normal(k_x, (N, F_IN), jnp.float32)
    W = xavier_uniform(k_w, (F_IN, F_OUT), gain=1.414)
    a = xavier_uniform(k_a, (2 * F_OUT, 1), gain=1.414)

    # deterministic edge list: self-loops + one extra directed edge per node
    src = np.concatenate([np.arange(N), np.arange(N)])
    dst = np.concatenate([np.arange(N), (np.arange(N) * 3 + 1) % N])
    edges = jnp.asarray(np.stack([src, dst]), jnp.int32)

    out = jax.block_until_ready(gat_forward(x, W, a, edges))
    ref = reference_forward(x, W, a, edges)

    # bf16 MXU inputs (fp32 accumulation / softmax) give ~1e-2-level deviations
    # from the strict fp32 reference; any tiling / masking / online-softmax /
    # padding bug would produce O(1) errors and still fail this check.
    np.testing.assert_allclose(np.asarray(out), np.asarray(ref),
                               rtol=5e-2, atol=5e-2)

    print("KERNEL_OK")
</pallas_src>

<mosaic_0001>
module attributes {stable_mosaic.version = 11 : i64} {
  func.func @proj_kernel(%arg0: i32, %arg1: memref<256x16xbf16, #tpu.memory_space<vmem>>, %arg2: memref<16x128xbf16, #tpu.memory_space<vmem>>, %arg3: memref<16x128xbf16, #tpu.memory_space<vmem>>, %arg4: memref<256x128xbf16, #tpu.memory_space<vmem>>, %arg5: memref<256x128xf32, #tpu.memory_space<vmem>>) attributes {dimension_semantics = [#tpu.dimension_semantics<parallel>], iteration_bounds = array<i64: 2>, scalar_prefetch = 0 : i64, scratch_operands = 0 : i64, tpu.core_type = #tpu.core_type<tc>, window_params = [{transform_indices = @transform_0, window_bounds = array<i64: 256, 16>}, {pipeline_mode = #tpu.pipeline_mode<synchronous>, transform_indices = @transform_1, window_bounds = array<i64: 16, 128>}, {pipeline_mode = #tpu.pipeline_mode<synchronous>, transform_indices = @transform_2, window_bounds = array<i64: 16, 128>}, {transform_indices = @transform_3, window_bounds = array<i64: 256, 128>}, {transform_indices = @transform_4, window_bounds = array<i64: 256, 128>}]} {
    %c0 = arith.constant 0 : index
    %c0_0 = arith.constant 0 : index
    %0 = vector.load %arg1[%c0, %c0_0] : memref<256x16xbf16, #tpu.memory_space<vmem>>, vector<256x16xbf16>
    %c0_1 = arith.constant 0 : index
    %c0_2 = arith.constant 0 : index
    %1 = vector.load %arg2[%c0_1, %c0_2] : memref<16x128xbf16, #tpu.memory_space<vmem>>, vector<16x128xbf16>
    %cst = arith.constant dense<0.000000e+00> : vector<256x128xf32>
    %2 = tpu.matmul %0, %1, %cst {dimension_numbers = #tpu.dot_dimension_numbers<[1], [0], [0], [1], [0, 0, 1, 1], [], []>} : vector<256x16xbf16>, vector<16x128xbf16>, vector<256x128xf32> -> vector<256x128xf32>
    %3 = arith.truncf %2 : vector<256x128xf32> to vector<256x128xbf16>
    %c0_3 = arith.constant 0 : index
    %c0_4 = arith.constant 0 : index
    %4 = vector.load %arg4[%c0_3, %c0_4] : memref<256x128xbf16, #tpu.memory_space<vmem>>, vector<256x128xbf16>
    tpu.vector_store %arg4[%c0_3, %c0_4], %3 {strides = array<i32>} : memref<256x128xbf16, #tpu.memory_space<vmem>>, vector<256x128xbf16>,
    %c0_5 = arith.constant 0 : index
    %c0_6 = arith.constant 0 : index
    %5 = vector.load %arg3[%c0_5, %c0_6] : memref<16x128xbf16, #tpu.memory_space<vmem>>, vector<16x128xbf16>
    %cst_7 = arith.constant dense<0.000000e+00> : vector<256x128xf32>
    %6 = tpu.matmul %0, %5, %cst_7 {dimension_numbers = #tpu.dot_dimension_numbers<[1], [0], [0], [1], [0, 0, 1, 1], [], []>} : vector<256x16xbf16>, vector<16x128xbf16>, vector<256x128xf32> -> vector<256x128xf32>
    %c0_8 = arith.constant 0 : index
    %c0_9 = arith.constant 0 : index
    %7 = vector.load %arg5[%c0_8, %c0_9] : memref<256x128xf32, #tpu.memory_space<vmem>>, vector<256x128xf32>
    tpu.vector_store %arg5[%c0_8, %c0_9], %6 {strides = array<i32>} : memref<256x128xf32, #tpu.memory_space<vmem>>, vector<256x128xf32>,
    return
  }
  func.func @transform_0(%arg0: i32) -> (i32, i32) {
    %c0_i32 = arith.constant 0 : i32
    %c0_i32_0 = arith.constant 0 : i32
    return %arg0, %c0_i32 : i32, i32
  }
  func.func @transform_1(%arg0: i32) -> (i32, i32) {
    %c0_i32 = arith.constant 0 : i32
    %c0_i32_0 = arith.constant 0 : i32
    %c0_i32_1 = arith.constant 0 : i32
    return %c0_i32, %c0_i32_0 : i32, i32
  }
  func.func @transform_2(%arg0: i32) -> (i32, i32) {
    %c0_i32 = arith.constant 0 : i32
    %c0_i32_0 = arith.constant 0 : i32
    %c0_i32_1 = arith.constant 0 : i32
    return %c0_i32, %c0_i32_0 : i32, i32
  }
  func.func @transform_3(%arg0: i32) -> (i32, i32) {
    %c0_i32 = arith.constant 0 : i32
    %c0_i32_0 = arith.constant 0 : i32
    return %arg0, %c0_i32 : i32, i32
  }
  func.func @transform_4(%arg0: i32) -> (i32, i32) {
    %c0_i32 = arith.constant 0 : i32
    %c0_i32_0 = arith.constant 0 : i32
    return %arg0, %c0_i32 : i32, i32
  }
}

</mosaic_0001>

<bundles_post_ra>
// kernel: tpu_custom_call.1
= control target key start
LH: loop header
LB: loop body
LE: loop exit
PB: predicated region body
PF: predicated region fallthrough
CT: control target
= control target key end

     0   :  { %10 = vsyncpa [#allocation3], 0  ;;  %s1802_s0 = inlined_call_operand.vmem [shape: bf16[512,16], index: 0, kind: input, shape index: {}]   ;;  %s1803_s1 = inlined_call_operand.vmem [shape: bf16[16,128], index: 1, kind: input, shape index: {}]   ;;  %s1804_s2 = inlined_call_operand.vmem [shape: bf16[16,128], index: 2, kind: input, shape index: {}]   ;;  %s1805_s3 = inlined_call_operand.hbm [shape: bf16[512,128], index: 3, kind: output, shape index: {0}]   ;;  %s1806_s4 = inlined_call_operand.hbm [shape: f32[512,128], index: 4, kind: output, shape index: {1}]  }
   0x1   :  { %12 = vsyncpa [#allocation3 + $0x1], 0 }
   0x2   :  { %13 = vsyncpa [#allocation5], 0 }
   0x3   :  { %15 = vsyncpa [#allocation5 + $0x1], 0  ;;  %s1554_s15 = smov 0   ;;  %s1556_s16 = smov 0  }
   0x4   :  { %s1558_s17 = smov 0   ;;  %s1560_s18 = smov 0  }
   0x5 LB: > { %s1575_s19 = sadd.s32 4294967295, %s1521_s18   ;;  %s1032_s20 = sadd.s32 4294967294, %s1521_s18   ;;  %s1521_s18 = sphi %s1560_s18, %s1812_s18   ;;  %s1517_s17 = sphi %s1558_s17, %s1811_s17   ;;  %s1513_s16 = sphi %s1556_s16, %s1810_s16   ;;  %s1509_s15 = sphi %s1554_s15, %s1809_s15  }
   0x6   : > { %s1579_s21 = sadd.s32 1, %s1521_s18   ;;  %s96_s22 = sadd.s32 1, %s1517_s17 }
   0x7   : > { %s93_s23 = ssub.s32 %s1521_s18, %s1579_s21  ;;  %p106_p0 = scmp.ne.s32.totalorder %s1517_s17, %s1513_s16 }
   0x8   : > { %p94_p1 = scmp.eq.s32.totalorder %s93_s23, 0  ;;  %p107_p2 = scmp.eq.s32.totalorder %s1575_s19, 1 }
   0x9   : > { %p112_p3 = scmp.ne.s32.totalorder %s1513_s16, %s1509_s15  ;;  %p113_p4 = scmp.eq.s32.totalorder %s1032_s20, 1 }
   0xa   : > { %s1590_s24 = scalar_select %p94_p1, %s1517_s17, %s96_s22  }
   0xb   : > { %p1592_p5 = por %p107_p2, %p106_p0  ;;  %p1596_p6 = por %p113_p4, %p112_p3 }
   0xc   : > { %p1035_p7 = scmp.ge.s32.totalorder %s1521_s18, 1  ;;  %p172_p8 = scmp.lt.s32.totalorder %s1521_s18, 3 }
   0xe   : > { %p173_p9 = pnand %p1035_p7, %p172_p8 }
   0xf   : > { %v1409_v0 = vld [vmem:[%s1803_s1] sm:$0xff] (!%p173_p9)   ;;  %s1038_s29 = sshll.u32 (!%p173_p9), %s1575_s19, 5  ;;  %vm332_vm0 = vcmask (!%p173_p9), 130048   ;;  %s1663_s10 = sand.u32 (!%p173_p9), 1, %s1513_s16  }
  0x10   : > { %176 = sbr.rel (%p173_p9) target bundleno = 339 (0x153), region = 32  ;;  %v1410_v1 = vld [vmem:[%s1804_s2] sm:$0xff] (!%p173_p9)   ;;  %p204_p10 = scmp.lt.s32.totalorder (!%p173_p9), %s1038_s29, 63  ;;  %1293 = vmatprep.subr.bf16.mxu0 (!%p173_p9), %v1409_v0 }
  0x11   : > { %1327 = vmatprep.subr.bf16.mxu1 (!%p173_p9), %v1410_v1  ;;  %1294 = vmatpush3.bf16.msra.mxu0 (!%p173_p9), %v1409_v0  ;;  %s1037_s11 = sshll.u32 (!%p173_p9), %s1663_s10, 8  ;;  %s1036_s12 = sshll.u32 (!%p173_p9), %s1663_s10, 7 }
  0x12   : > { %1328 = vmatpush3.bf16.msra.mxu1 (!%p173_p9), %v1410_v1  ;;  %s1667_s13 = scalar_lea.vmem (!%p173_p9), [#allocation4], %s1037_s11  ;;  %s1673_s14 = scalar_lea.vmem (!%p173_p9), [#allocation2], %s1036_s12 }
  0x13   : > { %s1163_s20 = sshll.u32 (!%p173_p9), %s1575_s19, 12  ;;  %s938_s22 = sshll.u32 (!%p173_p9), %s1667_s13, 4  ;;  %s1723_s22 = int_to_ptr.vmem [resolvable:$true] %s938_s22 }
  0x14   : > { %s1162_s23 = sshll.u32 (!%p173_p9), %s1575_s19, 11  ;;  %s922_s27 = sshll.u32 (!%p173_p9), %s1673_s14, 4  ;;  %s1732_s27 = int_to_ptr.vmem [resolvable:$true] %s922_s27 }
  0x15   : > { %s1721_s30 = scalar_lea.hbm (!%p173_p9), %s1806_s4, %s1163_s20  ;;  %s909_s7 = scalar_lea.sflag (!%p173_p9), [#allocation5], %s1663_s10 }
  0x16   : > { %s1427_s8 = scalar_lea.vmem (!%p173_p9), %s1723_s22, 4096 }
  0x17   : > { %s1814_s29 = smov (!%p204_p10, %s1038_s29), 63  ;;  %p1428_p11 = scmp.ne.s32.totalorder %s1723_s22, %s1427_s8 }
  0x18   : > { %s1039_s6 = sshll.u32 %s1814_s29, 2 }
  0x19   : > { %s1612_s9 = scalar_lea.vmem %s1802_s0, %s1039_s6  ;;  %s1730_s6 = scalar_lea.hbm %s1805_s3, %s1162_s23 }
  0x1a   : > { %v1411_v2 = vld [vmem:[%s1612_s9] sm:$0xff]   ;;  %v1412_v3 = vld [vmem:[%s1612_s9 + $0x8] sm:$0xff]   ;;  %v1413_v4 = vld [vmem:[%s1612_s9 + $0x10] sm:$0xff]   ;;  %p1429_p12 = pnand %p1428_p11, %p1592_p5 }
  0x1b   : > { %1295 = vmatprep.mubr.msk.bf16.mxu0 %vm332_vm0, %v1411_v2  ;;  %1329 = vmatprep.mubr.msk.bf16.mxu1 %vm332_vm0, %v1411_v2  ;;  %v1414_v5 = vld [vmem:[%s1612_s9 + $0x18] sm:$0xff]   ;;  %v1415_v6 = vld [vmem:[%s1612_s9 + $0x20] sm:$0xff]   ;;  %v1416_v7 = vld [vmem:[%s1612_s9 + $0x28] sm:$0xff]  }
  0x1c   : > { %1296 = vmatmul.mubr.msk.bf16.vlgmr.msra.gmra.mrb[0].mxu0 %vm332_vm0, %v1412_v3  ;;  %1330 = vmatmul.mubr.msk.bf16.vlgmr.msra.gmra.mrb[0].mxu1 %vm332_vm0, %v1412_v3  ;;  %v1417_v8 = vld [vmem:[%s1612_s9 + $0x30] sm:$0xff]   ;;  %v1418_v9 = vld [vmem:[%s1612_s9 + $0x38] sm:$0xff]   ;;  %v1419_v10 = vld [vmem:[%s1612_s9 + $0x40] sm:$0xff]   ;;  %p1430_p13 = pneg %p1429_p12 }
  0x1d   : > { %1299 = vmatprep.mubr.msk.bf16.mxu0 %vm332_vm0, %v1413_v4  ;;  %1333 = vmatprep.mubr.msk.bf16.mxu1 %vm332_vm0, %v1413_v4  ;;  %v1420_v11 = vld [vmem:[%s1612_s9 + $0x48] sm:$0xff]   ;;  %v1421_v12 = vld [vmem:[%s1612_s9 + $0x50] sm:$0xff]   ;;  %v1422_v13 = vld [vmem:[%s1612_s9 + $0x58] sm:$0xff]  }
  0x1e   : > { %v1423_v14 = vld [vmem:[%s1612_s9 + $0x60] sm:$0xff]   ;;  %v1424_v15 = vld [vmem:[%s1612_s9 + $0x68] sm:$0xff]   ;;  %v1425_v16 = vld [vmem:[%s1612_s9 + $0x70] sm:$0xff]  }
  0x1f   : > { %v1426_v17 = vld [vmem:[%s1612_s9 + $0x78] sm:$0xff]   ;;  %s1523_s9 = smov [#allocation4]  }
  0x20   : > { %s1431_s11 = sshll.u32 %s1523_s9, 4  ;;  %s1432_s11 = int_to_ptr.vmem [resolvable:$false] %s1431_s11 }
  0x21   : > { %s1433_s12 = scalar_lea.vmem %s1432_s11, 8192  ;;  %p1434_p0 = scmp.lt.s32.totalorder %s1723_s22, %s1432_s11 }
  0x22   : > { %p1435_p1 = scmp.lt.s32.totalorder %s1433_s12, %s1427_s8 }
  0x24   : > { %1300 = vmatmul.mubr.msk.bf16.gmra.mrb[4].mxu0 %vm332_vm0, %v1414_v5  ;;  %1334 = vmatmul.mubr.msk.bf16.gmra.mrb[4].mxu1 %vm332_vm0, %v1414_v5  ;;  %p1436_p2 = por %p1435_p1, %p1434_p0 }
  0x25   : > { %1303 = vmatprep.mubr.msk.bf16.mxu0 %vm332_vm0, %v1415_v6  ;;  %1337 = vmatprep.mubr.msk.bf16.mxu1 %vm332_vm0, %v1415_v6 }
  0x26   : > { %p1437_p3 = pnand %p1436_p2, %p1430_p13 }
  0x2c   : > { %1304 = vmatmul.mubr.msk.bf16.gmra.mrb[8].mxu0 %vm332_vm0, %v1416_v7  ;;  %1338 = vmatmul.mubr.msk.bf16.gmra.mrb[8].mxu1 %vm332_vm0, %v1416_v7 }
  0x2d   : > { %1307 = vmatprep.mubr.msk.bf16.mxu0 %vm332_vm0, %v1417_v8  ;;  %1341 = vmatprep.mubr.msk.bf16.mxu1 %vm332_vm0, %v1417_v8 }
  0x34   : > { %1308 = vmatmul.mubr.msk.bf16.gmra.mrb[12].mxu0 %vm332_vm0, %v1418_v9  ;;  %1342 = vmatmul.mubr.msk.bf16.gmra.mrb[12].mxu1 %vm332_vm0, %v1418_v9 }
  0x35   : > { %1311 = vmatprep.mubr.msk.bf16.mxu0 %vm332_vm0, %v1419_v10  ;;  %1345 = vmatprep.mubr.msk.bf16.mxu1 %vm332_vm0, %v1419_v10 }
  0x3c   : > { %1312 = vmatmul.mubr.msk.bf16.gmra.mrb[16].mxu0 %vm332_vm0, %v1420_v11  ;;  %1346 = vmatmul.mubr.msk.bf16.gmra.mrb[16].mxu1 %vm332_vm0, %v1420_v11 }
  0x3d   : > { %1315 = vmatprep.mubr.msk.bf16.mxu0 %vm332_vm0, %v1421_v12  ;;  %1349 = vmatprep.mubr.msk.bf16.mxu1 %vm332_vm0, %v1421_v12 }
  0x44   : > { %1316 = vmatmul.mubr.msk.bf16.gmra.mrb[20].mxu0 %vm332_vm0, %v1422_v13  ;;  %1350 = vmatmul.mubr.msk.bf16.gmra.mrb[20].mxu1 %vm332_vm0, %v1422_v13 }
  0x45   : > { %1319 = vmatprep.mubr.msk.bf16.mxu0 %vm332_vm0, %v1423_v14  ;;  %1353 = vmatprep.mubr.msk.bf16.mxu1 %vm332_vm0, %v1423_v14 }
  0x4c   : > { %1320 = vmatmul.mubr.msk.bf16.gmra.mrb[24].mxu0 %vm332_vm0, %v1424_v15  ;;  %1354 = vmatmul.mubr.msk.bf16.gmra.mrb[24].mxu1 %vm332_vm0, %v1424_v15 }
  0x4d   : > { %1323 = vmatprep.mubr.msk.bf16.mxu0 %vm332_vm0, %v1425_v16  ;;  %1357 = vmatprep.mubr.msk.bf16.mxu1 %vm332_vm0, %v1425_v16 }
  0x54   : > { %1324 = vmatmul.mubr.msk.bf16.gmra.mrb[28].mxu0 %vm332_vm0, %v1426_v17  ;;  %1358 = vmatmul.mubr.msk.bf16.gmra.mrb[28].mxu1 %vm332_vm0, %v1426_v17 }
  0xef   : > { %v1297_v18 = vpop.f32.mrb[0].mxu0  ;;  %v1331_v19 = vpop.f32.mrb[0].mxu1 }
  0xf0   : > { %873 = vst [vmem:[%s1667_s13 + $0x10] sm:$0xff] %v1331_v19  ;;  %v415_v20 = vpop.f32.mrb[1].mxu0  ;;  %v744_v21 = vpop.f32.mrb[1].mxu1 }
  0xf1   : > { %871 = vst [vmem:[%s1667_s13] sm:$0xff] %v744_v21  ;;  %v1298_v22 = vpop.f32.mrb[2].mxu0  ;;  %v1332_v23 = vpop.f32.mrb[2].mxu1 }
  0xf2   : > { %v1172_v24 = vpack.c.bf16 %v1298_v22, %v1297_v18  ;;  %874 = vst [vmem:[%s1667_s13 + $0x18] sm:$0xff] %v1332_v23  ;;  %v418_v25 = vpop.f32.mrb[3].mxu0  ;;  %v747_v26 = vpop.f32.mrb[3].mxu1 }
  0xf3   : > { %v1167_v27 = vpack.c.bf16 %v418_v25, %v415_v20  ;;  %872 = vst [vmem:[%s1667_s13 + $0x8] sm:$0xff] %v747_v26 }
  0xf4   : > { %1244 = vst [vmem:[%s1673_s14 + $0x8] sm:$0xff] %v1172_v24  }
  0xf5   : > { %1168 = vst [vmem:[%s1673_s14] sm:$0xff] %v1167_v27  }
  0xf7   : > { %v1301_v28 = vpop.f32.mrb[4].mxu0  ;;  %v1335_v29 = vpop.f32.mrb[4].mxu1 }
  0xf8   : > { %877 = vst [vmem:[%s1667_s13 + $0x30] sm:$0xff] %v1335_v29  ;;  %v431_v30 = vpop.f32.mrb[5].mxu0  ;;  %v760_v31 = vpop.f32.mrb[5].mxu1 }
  0xf9   : > { %875 = vst [vmem:[%s1667_s13 + $0x20] sm:$0xff] %v760_v31  ;;  %v1302_v32 = vpop.f32.mrb[6].mxu0  ;;  %v1336_v33 = vpop.f32.mrb[6].mxu1 }
  0xfa   : > { %v1182_v34 = vpack.c.bf16 %v1302_v32, %v1301_v28  ;;  %878 = vst [vmem:[%s1667_s13 + $0x38] sm:$0xff] %v1336_v33  ;;  %v434_v35 = vpop.f32.mrb[7].mxu0  ;;  %v763_v36 = vpop.f32.mrb[7].mxu1 }
  0xfb   : > { %v1177_v37 = vpack.c.bf16 %v434_v35, %v431_v30  ;;  %876 = vst [vmem:[%s1667_s13 + $0x28] sm:$0xff] %v763_v36 }
  0xfc   : > { %1246 = vst [vmem:[%s1673_s14 + $0x18] sm:$0xff] %v1182_v34  }
  0xfd   : > { %1245 = vst [vmem:[%s1673_s14 + $0x10] sm:$0xff] %v1177_v37  }
  0xff   : > { %v1305_v38 = vpop.f32.mrb[8].mxu0  ;;  %v1339_v39 = vpop.f32.mrb[8].mxu1 }
 0x100   : > { %881 = vst [vmem:[%s1667_s13 + $0x50] sm:$0xff] %v1339_v39  ;;  %v447_v40 = vpop.f32.mrb[9].mxu0  ;;  %v776_v41 = vpop.f32.mrb[9].mxu1 }
 0x101   : > { %879 = vst [vmem:[%s1667_s13 + $0x40] sm:$0xff] %v776_v41  ;;  %v1306_v42 = vpop.f32.mrb[10].mxu0  ;;  %v1340_v43 = vpop.f32.mrb[10].mxu1 }
 0x102   : > { %v1192_v44 = vpack.c.bf16 %v1306_v42, %v1305_v38  ;;  %882 = vst [vmem:[%s1667_s13 + $0x58] sm:$0xff] %v1340_v43  ;;  %v450_v45 = vpop.f32.mrb[11].mxu0  ;;  %v779_v46 = vpop.f32.mrb[11].mxu1 }
 0x103   : > { %v1187_v47 = vpack.c.bf16 %v450_v45, %v447_v40  ;;  %880 = vst [vmem:[%s1667_s13 + $0x48] sm:$0xff] %v779_v46 }
 0x104   : > { %1248 = vst [vmem:[%s1673_s14 + $0x28] sm:$0xff] %v1192_v44  }
 0x105   : > { %1247 = vst [vmem:[%s1673_s14 + $0x20] sm:$0xff] %v1187_v47  }
 0x107   : > { %v1309_v48 = vpop.f32.mrb[12].mxu0  ;;  %v1343_v49 = vpop.f32.mrb[12].mxu1 }
 0x108   : > { %885 = vst [vmem:[%s1667_s13 + $0x70] sm:$0xff] %v1343_v49  ;;  %v463_v50 = vpop.f32.mrb[13].mxu0  ;;  %v792_v51 = vpop.f32.mrb[13].mxu1 }
 0x109   : > { %883 = vst [vmem:[%s1667_s13 + $0x60] sm:$0xff] %v792_v51  ;;  %v1310_v52 = vpop.f32.mrb[14].mxu0  ;;  %v1344_v53 = vpop.f32.mrb[14].mxu1 }
 0x10a   : > { %v1202_v54 = vpack.c.bf16 %v1310_v52, %v1309_v48  ;;  %886 = vst [vmem:[%s1667_s13 + $0x78] sm:$0xff] %v1344_v53  ;;  %v466_v55 = vpop.f32.mrb[15].mxu0  ;;  %v795_v56 = vpop.f32.mrb[15].mxu1 }
 0x10b   : > { %v1197_v57 = vpack.c.bf16 %v466_v55, %v463_v50  ;;  %884 = vst [vmem:[%s1667_s13 + $0x68] sm:$0xff] %v795_v56 }
 0x10c   : > { %1250 = vst [vmem:[%s1673_s14 + $0x38] sm:$0xff] %v1202_v54  }
 0x10d   : > { %1249 = vst [vmem:[%s1673_s14 + $0x30] sm:$0xff] %v1197_v57  }
 0x10f   : > { %v1313_v58 = vpop.f32.mrb[16].mxu0  ;;  %v1347_v59 = vpop.f32.mrb[16].mxu1 }
 0x110   : > { %889 = vst [vmem:[%s1667_s13 + $0x90] sm:$0xff] %v1347_v59  ;;  %v479_v60 = vpop.f32.mrb[17].mxu0  ;;  %v808_v61 = vpop.f32.mrb[17].mxu1 }
 0x111   : > { %887 = vst [vmem:[%s1667_s13 + $0x80] sm:$0xff] %v808_v61  ;;  %v1314_v62 = vpop.f32.mrb[18].mxu0  ;;  %v1348_v63 = vpop.f32.mrb[18].mxu1 }
 0x112   : > { %v1212_v0 = vpack.c.bf16 %v1314_v62, %v1313_v58  ;;  %890 = vst [vmem:[%s1667_s13 + $0x98] sm:$0xff] %v1348_v63  ;;  %v482_v1 = vpop.f32.mrb[19].mxu0  ;;  %v811_v2 = vpop.f32.mrb[19].mxu1 }
 0x113   : > { %v1207_v3 = vpack.c.bf16 %v482_v1, %v479_v60  ;;  %888 = vst [vmem:[%s1667_s13 + $0x88] sm:$0xff] %v811_v2 }
 0x114   : > { %1252 = vst [vmem:[%s1673_s14 + $0x48] sm:$0xff] %v1212_v0  }
 0x115   : > { %1251 = vst [vmem:[%s1673_s14 + $0x40] sm:$0xff] %v1207_v3  }
 0x117   : > { %v1317_v4 = vpop.f32.mrb[20].mxu0  ;;  %v1351_v5 = vpop.f32.mrb[20].mxu1 }
 0x118   : > { %893 = vst [vmem:[%s1667_s13 + $0xb0] sm:$0xff] %v1351_v5  ;;  %v495_v6 = vpop.f32.mrb[21].mxu0  ;;  %v824_v7 = vpop.f32.mrb[21].mxu1 }
 0x119   : > { %891 = vst [vmem:[%s1667_s13 + $0xa0] sm:$0xff] %v824_v7  ;;  %v1318_v8 = vpop.f32.mrb[22].mxu0  ;;  %v1352_v9 = vpop.f32.mrb[22].mxu1 }
 0x11a   : > { %v1222_v10 = vpack.c.bf16 %v1318_v8, %v1317_v4  ;;  %894 = vst [vmem:[%s1667_s13 + $0xb8] sm:$0xff] %v1352_v9  ;;  %v498_v11 = vpop.f32.mrb[23].mxu0  ;;  %v827_v12 = vpop.f32.mrb[23].mxu1 }
 0x11b   : > { %v1217_v13 = vpack.c.bf16 %v498_v11, %v495_v6  ;;  %892 = vst [vmem:[%s1667_s13 + $0xa8] sm:$0xff] %v827_v12 }
 0x11c   : > { %1254 = vst [vmem:[%s1673_s14 + $0x58] sm:$0xff] %v1222_v10  }
 0x11d   : > { %1253 = vst [vmem:[%s1673_s14 + $0x50] sm:$0xff] %v1217_v13  }
 0x11f   : > { %v1321_v14 = vpop.f32.mrb[24].mxu0  ;;  %v1355_v15 = vpop.f32.mrb[24].mxu1 }
 0x120   : > { %897 = vst [vmem:[%s1667_s13 + $0xd0] sm:$0xff] %v1355_v15  ;;  %v511_v16 = vpop.f32.mrb[25].mxu0  ;;  %v840_v17 = vpop.f32.mrb[25].mxu1 }
 0x121   : > { %895 = vst [vmem:[%s1667_s13 + $0xc0] sm:$0xff] %v840_v17  ;;  %v1322_v18 = vpop.f32.mrb[26].mxu0  ;;  %v1356_v19 = vpop.f32.mrb[26].mxu1 }
 0x122   : > { %v1232_v20 = vpack.c.bf16 %v1322_v18, %v1321_v14  ;;  %898 = vst [vmem:[%s1667_s13 + $0xd8] sm:$0xff] %v1356_v19  ;;  %v514_v21 = vpop.f32.mrb[27].mxu0  ;;  %v843_v22 = vpop.f32.mrb[27].mxu1 }
 0x123   : > { %v1227_v23 = vpack.c.bf16 %v514_v21, %v511_v16  ;;  %896 = vst [vmem:[%s1667_s13 + $0xc8] sm:$0xff] %v843_v22 }
 0x124   : > { %1256 = vst [vmem:[%s1673_s14 + $0x68] sm:$0xff] %v1232_v20  }
 0x125   : > { %1255 = vst [vmem:[%s1673_s14 + $0x60] sm:$0xff] %v1227_v23  }
 0x127   : > { %v1325_v24 = vpop.f32.mrb[28].mxu0  ;;  %v1359_v25 = vpop.f32.mrb[28].mxu1 }
 0x128   : > { %901 = vst [vmem:[%s1667_s13 + $0xf0] sm:$0xff] %v1359_v25  ;;  %v527_v26 = vpop.f32.mrb[29].mxu0  ;;  %v856_v27 = vpop.f32.mrb[29].mxu1 }
 0x129   : > { %899 = vst [vmem:[%s1667_s13 + $0xe0] sm:$0xff] %v856_v27  ;;  %v1326_v28 = vpop.f32.mrb[30].mxu0  ;;  %v1360_v29 = vpop.f32.mrb[30].mxu1 }
 0x12a   : > { %v1242_v30 = vpack.c.bf16 %v1326_v28, %v1325_v24  ;;  %902 = vst [vmem:[%s1667_s13 + $0xf8] sm:$0xff] %v1360_v29  ;;  %v530_v31 = vpop.f32.mrb[31].mxu0  ;;  %v859_v32 = vpop.f32.mrb[31].mxu1 }
 0x12b   : > { %v1237_v33 = vpack.c.bf16 %v530_v31, %v527_v26  ;;  %900 = vst [vmem:[%s1667_s13 + $0xe8] sm:$0xff] %v859_v32 }
 0x12c   : > { %1258 = vst [vmem:[%s1673_s14 + $0x78] sm:$0xff] %v1242_v30  }
 0x12d   : > { %1440 = shalt.err (!%p1437_p3)
}
 0x12e   : > { %s1441_s13 = scalar_lea.hbm %s1721_s30, 4096  ;;  %s1445_s28 = scalar_lea.hbm %s1806_s4, 8192 }
 0x12f   : > { %p1442_p4 = scmp.ne.s32.totalorder %s1721_s30, %s1441_s13  ;;  %p1446_p9 = scmp.lt.u32.totalorder %s1721_s30, %s1806_s4 }
 0x130   : > { %p1447_p10 = scmp.lt.u32.totalorder %s1445_s28, %s1441_s13  ;;  %p1449_p12 = scmp.lt.u32.totalorder %s1441_s13, %s1721_s30 }
 0x131   : > { %p1443_p7 = pnand %p1442_p4, %p1592_p5 }
 0x132   : > { %p1448_p11 = por %p1447_p10, %p1446_p9 }
 0x133   : > { %p1444_p8 = pneg %p1443_p7 }
 0x134   : > { %p1450_p13 = por %p1449_p12, %p1448_p11 }
 0x136   : > { %p1451_p0 = pnand %p1450_p13, %p1444_p8 }
 0x138   : > { %1454 = shalt.err (!%p1451_p0)
}
 0x139   : > { %s1524_s5 = smov 128   ;;  %s1525_s8 = smov 8   ;;  %1257 = vst [vmem:[%s1673_s14 + $0x70] sm:$0xff] %v1237_v33  }
 0x13a   : > { %1362 = dma.vmem_to_hbm [thread:$0]  (%p1592_p5), %s1723_s22, 4096, %s1721_s30, %s909_s7, %s1524_s5, %s1524_s5, %s1525_s8  }
 0x13b   : > { %s904_s9 = scalar_lea.sflag [#allocation3], %s1663_s10  ;;  %s1455_s11 = scalar_lea.vmem %s1732_s27, 2048 }
 0x13c   : > { %p1456_p1 = scmp.ne.s32.totalorder %s1732_s27, %s1455_s11  ;;  %s1526_s12 = smov [#allocation2]  }
 0x13d   : > { %s1459_s13 = sshll.u32 %s1526_s12, 4  ;;  %s1460_s13 = int_to_ptr.vmem [resolvable:$false] %s1459_s13 }
 0x13e   : > { %p1457_p2 = pnand %p1456_p1, %p1592_p5  ;;  %s1461_s20 = scalar_lea.vmem %s1460_s13, 4096 }
 0x13f   : > { %p1462_p4 = scmp.lt.s32.totalorder %s1732_s27, %s1460_s13  ;;  %p1463_p7 = scmp.lt.s32.totalorder %s1461_s20, %s1455_s11 }
 0x140   : > { %p1458_p3 = pneg %p1457_p2 }
 0x141   : > { %p1464_p8 = por %p1463_p7, %p1462_p4 }
 0x143   : > { %p1465_p9 = pnand %p1464_p8, %p1458_p3 }
 0x145   : > { %1468 = shalt.err (!%p1465_p9)
}
 0x146   : > { %s1469_s14 = scalar_lea.hbm %s1730_s6, 2048  ;;  %s1473_s7 = scalar_lea.hbm %s1805_s3, 4096 }
 0x147   : > { %p1470_p10 = scmp.ne.s32.totalorder %s1730_s6, %s1469_s14  ;;  %p1474_p13 = scmp.lt.u32.totalorder %s1730_s6, %s1805_s3 }
 0x148   : > { %p1475_p0 = scmp.lt.u32.totalorder %s1473_s7, %s1469_s14  ;;  %p1477_p2 = scmp.lt.u32.totalorder %s1469_s14, %s1730_s6 }
 0x149   : > { %p1471_p11 = pnand %p1470_p10, %p1592_p5 }
 0x14a   : > { %p1476_p1 = por %p1475_p0, %p1474_p13 }
 0x14b   : > { %p1472_p12 = pneg %p1471_p11 }
 0x14c   : > { %p1478_p3 = por %p1477_p2, %p1476_p1 }
 0x14e   : > { %p1479_p4 = pnand %p1478_p3, %p1472_p12 }
 0x150   : > { %1482 = shalt.err (!%p1479_p4)
}
 0x151   : > { %s1527_s29 = smov 64   ;;  %s1528_s19 = smov 4  }
 0x152   : > { %1361 = dma.vmem_to_hbm [thread:$0]  (%p1592_p5), %s1732_s27, 2048, %s1730_s6, %s904_s9, %s1527_s29, %s1527_s29, %s1528_s19  }
 0x153 PF: > { %p1372_p7 = scmp.ge.s32.totalorder %s1521_s18, 2  ;;  %s953_s5 = sand.u32 1, %s1509_s15  }
 0x154   : > { %s954_s8 = scalar_lea.sflag [#allocation3], %s953_s5 }
 0x155   : > { %p1366_p8 = pnand %p1372_p7, %p1596_p6 }
 0x157   : > { %1500 = dma.done.wait (!%p1366_p8), %s954_s8, 2048  }
 0x158   : > { %1502 = vsyncadd (!%p1366_p8), %s954_s8, 4294965248  ;;  %s963_s11 = scalar_lea.sflag [#allocation5], %s953_s5 }
 0x159   : > { %1504 = dma.done.wait (!%p1366_p8), %s963_s11, 4096  }
 0x15a   : > { %1506 = vsyncadd (!%p1366_p8), %s963_s11, 4294963200  ;;  %p18_p5 = scmp.ge.s32.totalorder %s1579_s21, 4   ;;  %s1809_s15 = smov %s1513_s16 }
 0x15b   : > { %s1810_s16 = smov %s1517_s17  ;;  %s1811_s17 = smov %s1590_s24 }
 0x15c   : > { %s1812_s18 = smov %s1579_s21  ;;  %20 = sbr.rel (!%p18_p5) target bundleno = 5 (0x5), region = 84 }
 0x163   :  { %968 = vsyncpa [#allocation3], 1 }
 0x164   :  { %970 = vsyncpa [#allocation3 + $0x1], 1 }
 0x165   :  { %971 = vsyncpa [#allocation5], 1 }
 0x166   :  { %973 = vsyncpa [#allocation5 + $0x1], 1 }

</bundles_post_ra>
